<compile_context>
chip_gen: v7x
topology: tpu7x:2x2x1
jax: 0.10.0
libtpu: 0.0.40
codegen_flags: <defaults>
</compile_context>

<pallas_src>
import functools

import jax
import jax.numpy as jnp
from jax.experimental import pallas as pl
from jax.experimental.pallas import tpu as pltpu


def _mean_pool_kernel(mask_ref, inv_ref, x_ref, o_ref, *,
                      seq_len, seq_tile, ragged_s):
    # mask_ref: (TB, TS)      attention-mask block (int or float)
    # inv_ref:  (TB, 1) f32   precomputed 1 / clamp(sum(mask, 1), 1e-9)
    # x_ref:    (TB, TS, TH)  last_hidden_state block
    # o_ref:    (TB, TH) f32  output block, resident across the seq grid axis
    s = pl.program_id(2)

    @pl.when(s == 0)
    def _():
        o_ref[...] = jnp.zeros_like(o_ref)

    x = x_ref[...]
    m = mask_ref[...].astype(x.dtype)           # 0/1 -> exact in any float dtype
    contrib = x * m[:, :, None]                 # VPU broadcast multiply

    if ragged_s:
        # Last seq tile overhangs S: OOB reads of x AND mask are garbage, so gate
        # the product with an iota validity mask (static branch; zero cost when
        # S is tile-aligned).
        pos = s * seq_tile + jax.lax.broadcasted_iota(jnp.int32, mask_ref.shape, 1)
        contrib = jnp.where((pos < seq_len)[:, :, None],
                            contrib, jnp.zeros_like(contrib))

    # Sublane reduce over the seq tile with f32 accumulation.
    o_ref[...] += jnp.sum(contrib.astype(jnp.float32), axis=1)

    @pl.when(s == pl.num_programs(2) - 1)
    def _():
        o_ref[...] *= inv_ref[...]              # exact, precomputed reciprocal


def mean_pooling(last_hidden_state, attention_mask):
    """Pallas implementation of MeanPooling.forward.

    last_hidden_state: [B, S, H] (any float dtype)
    attention_mask:    [B, S]    (int or float, 0/1)
    returns:           [B, H]    float32
    """
    B, S, H = last_hidden_state.shape
    assert attention_mask.shape == (B, S)
    x = last_hidden_state
    itemsize = jnp.dtype(x.dtype).itemsize

    # Per-chip VMEM budget: 128 MiB on v5e/v6e, 64 MiB on v7x (conservative fallback).
    try:
        vmem_cap = int(getattr(pltpu.get_tpu_info(), "vmem_capacity_bytes", 64 << 20))
    except Exception:  # no TPU info available at trace time
        vmem_cap = 64 << 20
    vmem_limit = max(32 << 20, min(int(vmem_cap * 0.8), 112 << 20))
    x_block_budget = vmem_limit // 3            # double-buffered x + headroom

    TB = 8                                      # (8, lane)-aligned output tile

    # ---- choose seq tile (sublanes) and hidden tile (lanes) -----------------
    if TB * S * H * itemsize <= x_block_budget:
        TS, TH = S, H                           # single block per batch tile
    elif TB * 128 * H * itemsize <= x_block_budget:
        TH = H                                  # tile S only, keep output lane-dense
        TS = min((x_block_budget // (TB * H * itemsize)) // 128,
                 pl.cdiv(S, 128)) * 128
    else:
        TS = 128                                # huge H: tile H too (v7x 64 MiB VMEM)
        TH = max(128, min((x_block_budget // (TB * TS * itemsize)) // 128,
                          pl.cdiv(H, 128)) * 128)

    # Single batch tile -> split H so both v7x TensorCores get work.
    if B <= TB and TH == H and H % 256 == 0:
        TH = H // 2

    grid = (pl.cdiv(B, TB), pl.cdiv(H, TH), pl.cdiv(S, TS))
    ragged_s = (S % TS) != 0

    # Exact denominator, computed once in plain JAX (~1/H of the main HBM stream).
    cnt = jnp.sum(attention_mask.astype(jnp.float32), axis=1, keepdims=True)  # [B,1]
    inv = 1.0 / jnp.maximum(cnt, 1e-9)          # torch.clamp(min=1e-9)

    kernel = functools.partial(_mean_pool_kernel,
                               seq_len=S, seq_tile=TS, ragged_s=ragged_s)

    return pl.pallas_call(
        kernel,
        out_shape=jax.ShapeDtypeStruct((B, H), jnp.float32),
        grid_spec=pltpu.PrefetchScalarGridSpec(
            num_scalar_prefetch=0,
            grid=grid,
            in_specs=[
                pl.BlockSpec((TB, TS), lambda b, h, s: (b, s)),         # mask
                pl.BlockSpec((TB, 1), lambda b, h, s: (b, 0)),          # 1/count
                pl.BlockSpec((TB, TS, TH), lambda b, h, s: (b, s, h)),  # hidden states
            ],
            out_specs=pl.BlockSpec((TB, TH), lambda b, h, s: (b, h)),
        ),
        compiler_params=pltpu.CompilerParams(
            dimension_semantics=("parallel", "parallel", "arbitrary"),
            vmem_limit_bytes=vmem_limit,
        ),
    )(attention_mask, inv, x)


if __name__ == "__main__":
    key = jax.random.PRNGKey(0)
    k1, k2 = jax.random.split(key)

    B, S, H = 2, 8, 32
    last_hidden_state = jax.random.normal(k1, (B, S, H), dtype=jnp.float32)
    # Deterministic-ish binary mask with at least one valid token per row.
    attention_mask = (jax.random.uniform(k2, (B, S)) > 0.3).astype(jnp.int32)
    attention_mask = attention_mask.at[:, 0].set(1)

    out = mean_pooling(last_hidden_state, attention_mask)
    jax.block_until_ready(out)

    # Reference check in plain JAX (mirrors the PyTorch forward).
    mf = attention_mask[:, :, None].astype(jnp.float32)
    ref = jnp.sum(last_hidden_state * mf, axis=1) / jnp.maximum(
        jnp.sum(mf, axis=1), 1e-9
    )
    assert out.shape == (B, H)
    assert jnp.allclose(out, ref, atol=1e-5, rtol=1e-5), float(
        jnp.max(jnp.abs(out - ref))
    )

    print("KERNEL_OK")
</pallas_src>

<mosaic_0001>
module attributes {stable_mosaic.version = 11 : i64} {
  func.func @_mean_pool_kernel(%arg0: i32, %arg1: i32, %arg2: i32, %arg3: memref<8x8xi32, #tpu.memory_space<vmem>>, %arg4: memref<8x1xf32, #tpu.memory_space<vmem>>, %arg5: memref<8x8x32xf32, #tpu.memory_space<vmem>>, %arg6: memref<8x32xf32, #tpu.memory_space<vmem>>) attributes {dimension_semantics = [#tpu.dimension_semantics<parallel>, #tpu.dimension_semantics<parallel>, #tpu.dimension_semantics<arbitrary>], iteration_bounds = array<i64: 1, 1, 1>, scalar_prefetch = 0 : i64, scratch_operands = 0 : i64, tpu.core_type = #tpu.core_type<tc>, window_params = [{transform_indices = @transform_0, window_bounds = array<i64: 8, 8>}, {transform_indices = @transform_1, window_bounds = array<i64: 8, 1>}, {transform_indices = @transform_2, window_bounds = array<i64: 8, 8, 32>}, {transform_indices = @transform_3, window_bounds = array<i64: 8, 32>}]} {
    %c0_i32 = arith.constant 0 : i32
    %0 = arith.cmpi eq, %arg2, %c0_i32 : i32
    %1 = arith.extui %0 : i1 to i32
    %c0_i32_0 = arith.constant 0 : i32
    %2 = arith.cmpi ne, %1, %c0_i32_0 : i32
    scf.if %2 {
      %cst_11 = arith.constant 0.000000e+00 : f32
      %16 = vector.broadcast %cst_11 : f32 to vector<8x32xf32>
      %c0_12 = arith.constant 0 : index
      %c0_13 = arith.constant 0 : index
      %17 = vector.load %arg6[%c0_12, %c0_13] : memref<8x32xf32, #tpu.memory_space<vmem>>, vector<8x32xf32>
      tpu.vector_store %arg6[%c0_12, %c0_13], %16 {strides = array<i32>} : memref<8x32xf32, #tpu.memory_space<vmem>>, vector<8x32xf32>,
    } else {
    }
    %c0 = arith.constant 0 : index
    %c0_1 = arith.constant 0 : index
    %c0_2 = arith.constant 0 : index
    %3 = vector.load %arg5[%c0, %c0_1, %c0_2] : memref<8x8x32xf32, #tpu.memory_space<vmem>>, vector<8x8x32xf32>
    %c0_3 = arith.constant 0 : index
    %c0_4 = arith.constant 0 : index
    %4 = vector.load %arg3[%c0_3, %c0_4] : memref<8x8xi32, #tpu.memory_space<vmem>>, vector<8x8xi32>
    %5 = arith.sitofp %4 : vector<8x8xi32> to vector<8x8xf32>
    %6 = vector.shape_cast %5 : vector<8x8xf32> to vector<8x8x1xf32>
    %7 = vector.broadcast %6 : vector<8x8x1xf32> to vector<8x8x32xf32>
    %8 = arith.mulf %3, %7 : vector<8x8x32xf32>
    %c0_5 = arith.constant 0 : index
    %c0_6 = arith.constant 0 : index
    %9 = vector.load %arg6[%c0_5, %c0_6] : memref<8x32xf32, #tpu.memory_space<vmem>>, vector<8x32xf32>
    %cst = arith.constant dense<0.000000e+00> : vector<8x32xf32>
    %10 = vector.multi_reduction <add>, %8, %cst [1] : vector<8x8x32xf32> to vector<8x32xf32>
    %11 = arith.addf %9, %10 : vector<8x32xf32>
    %c0_7 = arith.constant 0 : index
    %c0_8 = arith.constant 0 : index
    %12 = vector.load %arg6[%c0_7, %c0_8] : memref<8x32xf32, #tpu.memory_space<vmem>>, vector<8x32xf32>
    tpu.vector_store %arg6[%c0_7, %c0_8], %11 {strides = array<i32>} : memref<8x32xf32, #tpu.memory_space<vmem>>, vector<8x32xf32>,
    %c0_i32_9 = arith.constant 0 : i32
    %13 = arith.cmpi eq, %arg2, %c0_i32_9 : i32
    %14 = arith.extui %13 : i1 to i32
    %c0_i32_10 = arith.constant 0 : i32
    %15 = arith.cmpi ne, %14, %c0_i32_10 : i32
    scf.if %15 {
      %c0_11 = arith.constant 0 : index
      %c0_12 = arith.constant 0 : index
      %16 = vector.load %arg6[%c0_11, %c0_12] : memref<8x32xf32, #tpu.memory_space<vmem>>, vector<8x32xf32>
      %c0_13 = arith.constant 0 : index
      %c0_14 = arith.constant 0 : index
      %17 = vector.load %arg4[%c0_13, %c0_14] : memref<8x1xf32, #tpu.memory_space<vmem>>, vector<8x1xf32>
      %18 = vector.broadcast %17 : vector<8x1xf32> to vector<8x32xf32>
      %19 = arith.mulf %16, %18 : vector<8x32xf32>
      %c0_15 = arith.constant 0 : index
      %c0_16 = arith.constant 0 : index
      %20 = vector.load %arg6[%c0_15, %c0_16] : memref<8x32xf32, #tpu.memory_space<vmem>>, vector<8x32xf32>
      tpu.vector_store %arg6[%c0_15, %c0_16], %19 {strides = array<i32>} : memref<8x32xf32, #tpu.memory_space<vmem>>, vector<8x32xf32>,
    } else {
    }
    return
  }
  func.func @transform_0(%arg0: i32, %arg1: i32, %arg2: i32) -> (i32, i32) {
    %c0_i32 = arith.constant 0 : i32
    return %arg0, %arg2 : i32, i32
  }
  func.func @transform_1(%arg0: i32, %arg1: i32, %arg2: i32) -> (i32, i32) {
    %c0_i32 = arith.constant 0 : i32
    %c0_i32_0 = arith.constant 0 : i32
    return %arg0, %c0_i32 : i32, i32
  }
  func.func @transform_2(%arg0: i32, %arg1: i32, %arg2: i32) -> (i32, i32, i32) {
    %c0_i32 = arith.constant 0 : i32
    return %arg0, %arg2, %arg1 : i32, i32, i32
  }
  func.func @transform_3(%arg0: i32, %arg1: i32, %arg2: i32) -> (i32, i32) {
    %c0_i32 = arith.constant 0 : i32
    return %arg0, %arg1 : i32, i32
  }
}

</mosaic_0001>

<bundles_post_ra>
// kernel: tpu_custom_call.1
= control target key start
LH: loop header
LB: loop body
LE: loop exit
PB: predicated region body
PF: predicated region fallthrough
CT: control target
= control target key end

     0   :  { %8 = vsyncpa [#allocation3], 0  ;;  %s347_s0 = inlined_call_operand.vmem [shape: s32[2,8], index: 0, kind: input, shape index: {}]   ;;  %s348_s1 = inlined_call_operand.vmem [shape: f32[2,1], index: 1, kind: input, shape index: {}]   ;;  %s349_s2 = inlined_call_operand.hbm [shape: f32[2,8,32], index: 2, kind: input, shape index: {}]   ;;  %s350_s3 = inlined_call_operand.hbm [shape: f32[2,32], index: 3, kind: output, shape index: {}]  }
   0x1   :  { %9 = vsyncpa [#allocation4], 0 }
   0x2   :  { %18 = vsyncadd [#allocation3], 768  ;;  %s278_s12 = smov [#allocation2]   ;;  %s230_s16 = scalar_lea.hbm %s349_s2, 256 }
   0x3   :  { %s19_s13 = sshll.u32 %s278_s12, 4  ;;  %p231_p0 = scmp.ne.s32.totalorder %s349_s2, %s230_s16  ;;  %s20_s13 = int_to_ptr.vmem [resolvable:$true] %s19_s13 }
   0x4   :  { %p234_p1 = scmp.lt.u32.totalorder %s230_s16, %s349_s2 }
   0x6   :  { %p236_p2 = pnand %p234_p1, %p231_p0 }
   0x8   :  { %239 = shalt.err (!%p236_p2)
}
   0x9   :  { %s240_s21 = scalar_lea.vmem %s20_s13, 256  ;;  %s244_s22 = scalar_lea.vmem %s20_s13, 1024 }
   0xa   :  { %p241_p3 = scmp.ne.s32.totalorder %s20_s13, %s240_s21  ;;  %p245_p4 = scmp.lt.s32.totalorder %s20_s13, %s20_s13 }
   0xb   :  { %p246_p5 = scmp.lt.s32.totalorder %s244_s22, %s240_s21 }
   0xd   :  { %p247_p6 = por %p246_p5, %p245_p4 }
   0xf   :  { %p248_p7 = pnand %p247_p6, %p241_p3 }
  0x11   :  { %251 = shalt.err (!%p248_p7)
}
  0x12   :  { %s279_s23 = smov 128   ;;  %s280_s24 = smov 8  }
  0x13   :  { %25 = dma.hbm_to_vmem [thread:$0]  %s349_s2, 256, %s20_s13, [#allocation3], %s279_s23, %s279_s23, %s280_s24  }
  0x14   :  { %274 = dma.done.wait [#allocation3], 1024  }
  0x15   :  { %275 = vsyncadd [#allocation3], 4294966272  ;;  %v45_v0 = vlaneseq  ;;  %v281_v1 = vmov 0   ;;  %v43_v5 = vld [vmem:[%s347_s0] sm:$0xff]  ;;  %vm33_vm0 = vcmask 261120   ;;  %v282_v21 = vmov 0.0  }
  0x16   :  { %229 = vset.pattern.permute.xlu0 %v281_v1  ;;  %v44_v6 = vcvt.s32.f32 %v43_v5  ;;  %34 = vst.msk [vmem:[#allocation5] sm:$0xff] %vm33_vm0, %v282_v21  ;;  %v196_v22 = vld [vmem:[%s348_s1] sm:$0xff]  ;;  %v37_v23 = vld [vmem:[#allocation2 + $0x10] sm:$0xff]  ;;  %v38_v29 = vld [vmem:[#allocation2 + $0x18] sm:$0xff]  ;;  %vm175_vm1 = vcmask 1041409   ;;  %vm177_vm2 = vcmask 1042434  }
  0x17   :  { %v46_v2 = vshrl.u32 %v45_v0, 7  ;;  %v35_v24 = vld [vmem:[#allocation2] sm:$0xff]  ;;  %v36_v30 = vld [vmem:[#allocation2 + $0x8] sm:$0xff]  ;;  %v42_v57 = vld [vmem:[#allocation2 + $0x38] sm:$0xff]  ;;  %vm179_vm3 = vcmask 1043459   ;;  %vm181_vm4 = vcmask 1044484  }
  0x18   :  { %v40_v41 = vld [vmem:[#allocation2 + $0x28] sm:$0xff]  ;;  %v39_v42 = vld [vmem:[#allocation2 + $0x20] sm:$0xff]  ;;  %v41_v58 = vld [vmem:[#allocation2 + $0x30] sm:$0xff]  ;;  %vm183_vm5 = vcmask 1045509   ;;  %vm185_vm6 = vcmask 1046534   ;;  %vm187_vm7 = vcmask 1047559  }
  0x19   :  { %v61_v3 = vsub.s32 2, %v46_v2  ;;  %v47_v4 = vsub.s32 0, %v46_v2  ;;  %v68_v7 = vsub.s32 3, %v46_v2  ;;  %v54_v8 = vsub.s32 1, %v46_v2 }
  0x1a   :  { %v82_v13 = vsub.s32 5, %v46_v2  ;;  %v75_v14 = vsub.s32 4, %v46_v2  ;;  %v96_v17 = vsub.s32 7, %v46_v2  ;;  %v89_v18 = vsub.s32 6, %v46_v2 }
  0x1b   :  { %v62_v9 = vrot.slane %v44_v6, %v61_v3  ;;  %v48_v10 = vrot.slane %v44_v6, %v47_v4  ;;  %v69_v11 = vrot.slane %v44_v6, %v68_v7  ;;  %v55_v12 = vrot.slane %v44_v6, %v54_v8 }
  0x1c   :  { %v83_v15 = vrot.slane %v44_v6, %v82_v13  ;;  %v76_v16 = vrot.slane %v44_v6, %v75_v14  ;;  %v97_v19 = vrot.slane %v44_v6, %v96_v17  ;;  %v90_v20 = vrot.slane %v44_v6, %v89_v18 }
  0x1d   :  { %64 = vbcast.lane.b32.xlu1 %v62_v9, 256  ;;  %50 = vbcast.lane.b32.xlu0 %v48_v10, 256 }
  0x21   :  { %71 = vbcast.lane.b32.xlu1 %v69_v11, 256  ;;  %57 = vbcast.lane.b32.xlu0 %v55_v12, 256 }
  0x25   :  { %85 = vbcast.lane.b32.xlu1 %v83_v15, 256  ;;  %78 = vbcast.lane.b32.xlu0 %v76_v16, 256 }
  0x29   :  { %99 = vbcast.lane.b32.xlu1 %v97_v19, 256  ;;  %92 = vbcast.lane.b32.xlu0 %v90_v20, 256 }
  0x2d   :  { %199 = vperm.xlu0 %229, %v196_v22  }
  0x8f   :  { %v65_v25 = vpop.permute.xlu1 %64  ;;  %v51_v26 = vpop.permute.xlu0 %50 }
  0x90   :  { %v103_v27 = vmul.f32 %v65_v25, %v37_v23  ;;  %v101_v28 = vmul.f32 %v51_v26, %v35_v24 }
  0x92   :  { %v125_v31 = vsel %vm33_vm0, %v103_v27, 0.0  ;;  %v111_v32 = vsel %vm33_vm0, %v101_v28, 0.0 }
  0x93   :  { %v126_v33 = vrot.slane %v125_v31, 4  ;;  %v112_v34 = vrot.slane %v111_v32, 4  ;;  %v72_v35 = vpop.permute.xlu1 %71  ;;  %v58_v36 = vpop.permute.xlu0 %57 }
  0x94   :  { %v104_v37 = vmul.f32 %v72_v35, %v38_v29  ;;  %v102_v38 = vmul.f32 %v58_v36, %v36_v30 }
  0x95   :  { %v127_v39 = vadd.f32 %v126_v33, %v125_v31  ;;  %v113_v40 = vadd.f32 %v112_v34, %v111_v32 }
  0x96   :  { %v132_v43 = vsel %vm33_vm0, %v104_v37, 0.0  ;;  %v118_v44 = vsel %vm33_vm0, %v102_v38, 0.0 }
  0x97   :  { %v128_v45 = vrot.slane %v127_v39, 2  ;;  %v114_v46 = vrot.slane %v113_v40, 2  ;;  %v133_v47 = vrot.slane %v132_v43, 4  ;;  %v119_v48 = vrot.slane %v118_v44, 4  ;;  %v86_v49 = vpop.permute.xlu1 %85  ;;  %v79_v50 = vpop.permute.xlu0 %78 }
  0x98   :  { %v106_v51 = vmul.f32 %v86_v49, %v40_v41  ;;  %v105_v52 = vmul.f32 %v79_v50, %v39_v42 }
  0x99   :  { %v129_v53 = vadd.f32 %v128_v45, %v127_v39  ;;  %v115_v54 = vadd.f32 %v114_v46, %v113_v40  ;;  %v134_v55 = vadd.f32 %v133_v47, %v132_v43  ;;  %v120_v56 = vadd.f32 %v119_v48, %v118_v44  ;;  %v109_v43 = vld [vmem:[#allocation5] sm:$0xff] }
  0x9a   :  { %v146_v59 = vsel %vm33_vm0, %v106_v51, 0.0  ;;  %v139_v60 = vsel %vm33_vm0, %v105_v52, 0.0 }
  0x9b   :  { %v135_v61 = vrot.slane %v134_v55, 2  ;;  %v121_v62 = vrot.slane %v120_v56, 2  ;;  %v100_v63 = vpop.permute.xlu1 %99  ;;  %v93_v0 = vpop.permute.xlu0 %92  ;;  %v147_v1 = vrot.slane %v146_v59, 4  ;;  %v140_v2 = vrot.slane %v139_v60, 4 }
  0x9c   :  { %v108_v3 = vmul.f32 %v100_v63, %v42_v57  ;;  %v107_v4 = vmul.f32 %v93_v0, %v41_v58  ;;  %v130_v5 = vrot.slane %v129_v53, 1  ;;  %v116_v6 = vrot.slane %v115_v54, 1 }
  0x9d   :  { %v136_v7 = vadd.f32 %v135_v61, %v134_v55  ;;  %v122_v8 = vadd.f32 %v121_v62, %v120_v56  ;;  %v148_v9 = vadd.f32 %v147_v1, %v146_v59  ;;  %v141_v10 = vadd.f32 %v140_v2, %v139_v60 }
  0x9e   :  { %v160_v11 = vsel %vm33_vm0, %v108_v3, 0.0  ;;  %v153_v12 = vsel %vm33_vm0, %v107_v4, 0.0  ;;  %v117_v19 = vadd.f32 %v116_v6, %v115_v54  ;;  %v131_v23 = vadd.f32 %v130_v5, %v129_v53 }
  0x9f   :  { %v137_v13 = vrot.slane %v136_v7, 1  ;;  %v123_v14 = vrot.slane %v122_v8, 1  ;;  %v161_v15 = vrot.slane %v160_v11, 4  ;;  %v154_v16 = vrot.slane %v153_v12, 4 }
  0xa0   :  { %v149_v17 = vrot.slane %v148_v9, 2  ;;  %v142_v18 = vrot.slane %v141_v10, 2 }
  0xa1   :  { %v124_v20 = vadd.f32 %v123_v14, %v122_v8  ;;  %v162_v21 = vadd.f32 %v161_v15, %v160_v11  ;;  %v155_v22 = vadd.f32 %v154_v16, %v153_v12  ;;  %v138_v26 = vadd.f32 %v137_v13, %v136_v7 }
  0xa2   :  { %v150_v24 = vadd.f32 %v149_v17, %v148_v9  ;;  %v143_v25 = vadd.f32 %v142_v18, %v141_v10 }
  0xa3   :  { %v176_v27 = vsel %vm175_vm1, %v124_v20, %v117_v19  ;;  %v163_v28 = vrot.slane %v162_v21, 2  ;;  %v156_v29 = vrot.slane %v155_v22, 2 }
  0xa4   :  { %v178_v30 = vsel %vm177_vm2, %v131_v23, %v176_v27  ;;  %v151_v31 = vrot.slane %v150_v24, 1  ;;  %v144_v32 = vrot.slane %v143_v25, 1 }
  0xa5   :  { %v180_v33 = vsel %vm179_vm3, %v138_v26, %v178_v30  ;;  %v164_v34 = vadd.f32 %v163_v28, %v162_v21  ;;  %v157_v35 = vadd.f32 %v156_v29, %v155_v22 }
  0xa6   :  { %v152_v36 = vadd.f32 %v151_v31, %v150_v24  ;;  %v145_v37 = vadd.f32 %v144_v32, %v143_v25 }
  0xa7   :  { %v165_v38 = vrot.slane %v164_v34, 1  ;;  %v158_v39 = vrot.slane %v157_v35, 1 }
  0xa8   :  { %v182_v40 = vsel %vm181_vm4, %v145_v37, %v180_v33 }
  0xa9   :  { %v166_v41 = vadd.f32 %v165_v38, %v164_v34  ;;  %v159_v42 = vadd.f32 %v158_v39, %v157_v35  ;;  %v184_v44 = vsel %vm183_vm5, %v152_v36, %v182_v40 }
  0xab   :  { %v186_v45 = vsel %vm185_vm6, %v159_v42, %v184_v44 }
  0xac   :  { %v188_v46 = vsel %vm187_vm7, %v166_v41, %v186_v45  ;;  %v200_v48 = vpop.permute.xlu0 %199 }
  0xad   :  { %v190_v47 = vadd.f32 %v188_v46, %v109_v43 }
  0xaf   :  { %191 = vst.msk [vmem:[#allocation5] sm:$0xff] %vm33_vm0, %v190_v47 }
  0xb6   :  { %v195_v49 = vld [vmem:[#allocation5] sm:$0xff] }
  0xb7   :  { %v202_v50 = vmul.f32 %v200_v48, %v195_v49 }
  0xb9   :  { %203 = vst.msk [vmem:[#allocation5] sm:$0xff] %vm33_vm0, %v202_v50 }
  0xba   :  { %208 = vsyncadd [#allocation4], 96  ;;  %s283_s1 = smov [#allocation5]  }
  0xbb   :  { %s209_s29 = sshll.u32 %s283_s1, 4  ;;  %s210_s29 = int_to_ptr.vmem [resolvable:$true] %s209_s29 }
  0xbc   :  { %s252_s30 = scalar_lea.vmem %s210_s29, 32  ;;  %s256_s4 = scalar_lea.vmem %s210_s29, 128 }
  0xbd   :  { %p253_p8 = scmp.ne.s32.totalorder %s210_s29, %s252_s30  ;;  %p257_p9 = scmp.lt.s32.totalorder %s210_s29, %s210_s29 }
  0xbe   :  { %p258_p10 = scmp.lt.s32.totalorder %s256_s4, %s252_s30 }
  0xc0   :  { %p259_p11 = por %p258_p10, %p257_p9 }
  0xc2   :  { %p260_p12 = pnand %p259_p11, %p253_p8 }
  0xc4   :  { %263 = shalt.err (!%p260_p12)
}
  0xc5   :  { %s264_s7 = scalar_lea.hbm %s350_s3, 32 }
  0xc6   :  { %p265_p13 = scmp.ne.s32.totalorder %s350_s3, %s264_s7  ;;  %p268_p0 = scmp.lt.u32.totalorder %s264_s7, %s350_s3 }
  0xc8   :  { %p270_p1 = pnand %p268_p0, %p265_p13 }
  0xca   :  { %273 = shalt.err (!%p270_p1)
}
  0xcb   :  { %s284_s12 = smov 32   ;;  %s285_s13 = smov 2  }
  0xcc   :  { %215 = dma.vmem_to_hbm [thread:$0]  %s210_s29, 32, %s350_s3, [#allocation4], %s284_s12, %s284_s12, %s285_s13  }
  0xcd   :  { %276 = dma.done.wait [#allocation4], 128  }
  0xce   :  { %277 = vsyncadd [#allocation4], 4294967168 }
  0xcf   :  { %219 = vsyncpa [#allocation3], 1 }
  0xd0   :  { %220 = vsyncpa [#allocation4], 1 }

</bundles_post_ra>
